<compile_context>
chip_gen: v5e
topology: v5e:2x2
jax: 0.10.0
libtpu: 0.0.40
codegen_flags: <defaults>
</compile_context>

<pallas_src>
from functools import partial

import jax
import jax.numpy as jnp
from jax.experimental import pallas as pl
from jax.experimental.pallas import tpu as pltpu

IN_DIM = 784
K_PAD = 896  # 7 * 128 -> full lane vregs / full MXU K-tiles


def _encoder_kernel(x_ref, w1_ref, b1_ref, w2_ref, b2_ref, out_ref):
    # x: [TB, K_PAD] bf16, w1: [K_PAD, 2H] bf16, w2: [2H, OUT_PAD] bf16
    x = x_ref[...]

    # fused first layer (mean & std branches share this single matmul)
    h = jnp.dot(x, w1_ref[...], preferred_element_type=jnp.float32)  # [TB, 2H] f32
    h = jnp.maximum(h + b1_ref[...], 0.0)                            # f32 epilogue

    # block-diagonal second layer -> one lane-dense [TB, OUT_PAD] result
    h = h.astype(w2_ref.dtype)
    out = jnp.dot(h, w2_ref[...], preferred_element_type=jnp.float32)
    out = out + b2_ref[...]
    out_ref[...] = out.astype(out_ref.dtype)


def pack_params(p):
    """Host-side, one-time packing of per-branch weights into fused bf16 tensors."""
    H = p["w1m"].shape[1]
    Z = p["w2m"].shape[1]
    OUT = 2 * Z
    OUT_PAD = ((OUT + 127) // 128) * 128

    # fused first layer: [K_PAD, 2H], biases [1, 2H]
    w1 = jnp.concatenate([p["w1m"], p["w1s"]], axis=1)          # [784, 2H]
    w1 = jnp.pad(w1, ((0, K_PAD - IN_DIM), (0, 0)))             # [896, 2H]
    b1 = jnp.concatenate([p["b1m"], p["b1s"]], axis=1)          # [1, 2H]

    # block-diagonal second layer: [2H, OUT_PAD], bias [1, OUT_PAD]
    w2 = jnp.zeros((2 * H, OUT_PAD), jnp.float32)
    w2 = w2.at[:H, :Z].set(p["w2m"])
    w2 = w2.at[H:, Z:OUT].set(p["w2s"])
    b2 = jnp.zeros((1, OUT_PAD), jnp.float32)
    b2 = b2.at[:, :Z].set(p["b2m"])
    b2 = b2.at[:, Z:OUT].set(p["b2s"])

    return dict(w1=w1.astype(jnp.bfloat16), b1=b1,
                w2=w2.astype(jnp.bfloat16), b2=b2)


@partial(jax.jit, static_argnames=("z_dim", "block_b"))
def encoder_forward(x, packed, *, z_dim, block_b=256):
    """x: [B, 784] f32. packed: output of pack_params. Returns (mean, std) [B, z_dim]."""
    w1, b1, w2, b2 = packed["w1"], packed["b1"], packed["w2"], packed["b2"]
    B = x.shape[0]
    H2 = w1.shape[1]          # 2 * hidden_dim
    OUT_PAD = w2.shape[1]

    # batch tiling: small batches run as a single full block, large batches
    # get a pipelined / megacore-parallel batch grid with resident weights.
    if B <= block_b:
        TB = max(8, ((B + 7) // 8) * 8)
    else:
        TB = block_b
    Bp = ((B + TB - 1) // TB) * TB

    xp = jnp.pad(x.astype(jnp.bfloat16),
                 ((0, Bp - B), (0, K_PAD - x.shape[1])))

    cost = pl.CostEstimate(
        flops=2 * Bp * (K_PAD * H2 + H2 * OUT_PAD),
        transcendentals=0,
        bytes_accessed=(xp.size * 2 + w1.size * 2 + w2.size * 2
                        + b1.size * 4 + b2.size * 4 + Bp * OUT_PAD * 4),
    )

    out = pl.pallas_call(
        _encoder_kernel,
        out_shape=jax.ShapeDtypeStruct((Bp, OUT_PAD), jnp.float32),
        grid=(Bp // TB,),
        in_specs=[
            pl.BlockSpec((TB, K_PAD), lambda i: (i, 0)),     # x tile, pipelined
            pl.BlockSpec((K_PAD, H2), lambda i: (0, 0)),     # W1 resident
            pl.BlockSpec((1, H2), lambda i: (0, 0)),         # b1 resident
            pl.BlockSpec((H2, OUT_PAD), lambda i: (0, 0)),   # W2 resident
            pl.BlockSpec((1, OUT_PAD), lambda i: (0, 0)),    # b2 resident
        ],
        out_specs=pl.BlockSpec((TB, OUT_PAD), lambda i: (i, 0)),
        compiler_params=pltpu.CompilerParams(
            dimension_semantics=("parallel",)),
        cost_estimate=cost,
    )(xp, w1, b1, w2, b2)

    mean = out[:B, :z_dim]
    std = out[:B, z_dim:2 * z_dim]
    # NOTE: the reference PyTorch forward applies no positivity constraint,
    # it just returns the raw linear output — reproduced exactly here.
    return mean, std


def init_params(key, in_dim=IN_DIM, hidden_dim=128, z_dim=32):
    """Deterministic synthetic parameters (PyTorch-Linear-like uniform init)."""
    ks = jax.random.split(key, 8)

    def lin(kw, kb, fan_in, fan_out):
        bound = 1.0 / jnp.sqrt(fan_in)
        w = jax.random.uniform(kw, (fan_in, fan_out), jnp.float32, -bound, bound)
        b = jax.random.uniform(kb, (1, fan_out), jnp.float32, -bound, bound)
        return w, b

    w1m, b1m = lin(ks[0], ks[1], in_dim, hidden_dim)
    w2m, b2m = lin(ks[2], ks[3], hidden_dim, z_dim)
    w1s, b1s = lin(ks[4], ks[5], in_dim, hidden_dim)
    w2s, b2s = lin(ks[6], ks[7], hidden_dim, z_dim)
    return dict(w1m=w1m, b1m=b1m, w2m=w2m, b2m=b2m,
                w1s=w1s, b1s=b1s, w2s=w2s, b2s=b2s)


def encoder_reference(x, p):
    """Pure-JAX f32 reference matching the PyTorch forward."""
    h_m = jnp.maximum(x @ p["w1m"] + p["b1m"], 0.0)
    mean = h_m @ p["w2m"] + p["b2m"]
    h_s = jnp.maximum(x @ p["w1s"] + p["b1s"], 0.0)
    std = h_s @ p["w2s"] + p["b2s"]
    return mean, std


if __name__ == "__main__":
    key = jax.random.PRNGKey(0)
    k_x, k_p = jax.random.split(key)

    B, IN, H, Z = 8, IN_DIM, 128, 32          # small hidden_dim / z_dim variant
    x = jax.random.uniform(k_x, (B, IN), jnp.float32)   # MNIST-like inputs in [0,1)
    params = init_params(k_p, IN, H, Z)

    packed = pack_params(params)              # one-time, hoisted off the hot path
    mean, std = encoder_forward(x, packed, z_dim=Z)
    jax.block_until_ready((mean, std))

    mean_ref, std_ref = encoder_reference(x, params)
    assert mean.shape == (B, Z) and std.shape == (B, Z)
    # bf16 matmul operands (f32 accumulate) -> loosened tolerance vs f32 reference
    assert jnp.allclose(mean, mean_ref, atol=3e-2, rtol=3e-2)
    assert jnp.allclose(std, std_ref, atol=3e-2, rtol=3e-2)

    print("KERNEL_OK")
</pallas_src>

<mosaic_0001>
module attributes {stable_mosaic.version = 11 : i64} {
  func.func @_encoder_kernel(%arg0: i32, %arg1: memref<8x896xbf16, #tpu.memory_space<vmem>>, %arg2: memref<896x256xbf16, #tpu.memory_space<vmem>>, %arg3: memref<1x256xf32, #tpu.memory_space<vmem>>, %arg4: memref<256x128xbf16, #tpu.memory_space<vmem>>, %arg5: memref<1x128xf32, #tpu.memory_space<vmem>>, %arg6: memref<8x128xf32, #tpu.memory_space<vmem>>) attributes {dimension_semantics = [#tpu.dimension_semantics<parallel>], iteration_bounds = array<i64: 1>, scalar_prefetch = 0 : i64, scratch_operands = 0 : i64, tpu.core_type = #tpu.core_type<tc>, window_params = [{transform_indices = @transform_0, window_bounds = array<i64: 8, 896>}, {pipeline_mode = #tpu.pipeline_mode<synchronous>, transform_indices = @transform_1, window_bounds = array<i64: 896, 256>}, {pipeline_mode = #tpu.pipeline_mode<synchronous>, transform_indices = @transform_2, window_bounds = array<i64: 1, 256>}, {pipeline_mode = #tpu.pipeline_mode<synchronous>, transform_indices = @transform_3, window_bounds = array<i64: 256, 128>}, {pipeline_mode = #tpu.pipeline_mode<synchronous>, transform_indices = @transform_4, window_bounds = array<i64: 1, 128>}, {transform_indices = @transform_5, window_bounds = array<i64: 8, 128>}]} {
    %c0 = arith.constant 0 : index
    %c0_0 = arith.constant 0 : index
    %0 = vector.load %arg1[%c0, %c0_0] : memref<8x896xbf16, #tpu.memory_space<vmem>>, vector<8x896xbf16>
    %c0_1 = arith.constant 0 : index
    %c0_2 = arith.constant 0 : index
    %1 = vector.load %arg2[%c0_1, %c0_2] : memref<896x256xbf16, #tpu.memory_space<vmem>>, vector<896x256xbf16>
    %cst = arith.constant dense<0.000000e+00> : vector<8x256xf32>
    %2 = tpu.matmul %0, %1, %cst {dimension_numbers = #tpu.dot_dimension_numbers<[1], [0], [0], [1], [0, 0, 1, 1], [], []>} : vector<8x896xbf16>, vector<896x256xbf16>, vector<8x256xf32> -> vector<8x256xf32>
    %c0_3 = arith.constant 0 : index
    %c0_4 = arith.constant 0 : index
    %3 = vector.load %arg3[%c0_3, %c0_4] : memref<1x256xf32, #tpu.memory_space<vmem>>, vector<1x256xf32>
    %4 = vector.broadcast %3 : vector<1x256xf32> to vector<8x256xf32>
    %5 = arith.addf %2, %4 : vector<8x256xf32>
    %cst_5 = arith.constant 0.000000e+00 : f32
    %6 = vector.broadcast %cst_5 : f32 to vector<8x256xf32>
    %7 = arith.maximumf %5, %6 : vector<8x256xf32>
    %8 = arith.truncf %7 : vector<8x256xf32> to vector<8x256xbf16>
    %c0_6 = arith.constant 0 : index
    %c0_7 = arith.constant 0 : index
    %9 = vector.load %arg4[%c0_6, %c0_7] : memref<256x128xbf16, #tpu.memory_space<vmem>>, vector<256x128xbf16>
    %cst_8 = arith.constant dense<0.000000e+00> : vector<8x128xf32>
    %10 = tpu.matmul %8, %9, %cst_8 {dimension_numbers = #tpu.dot_dimension_numbers<[1], [0], [0], [1], [0, 0, 1, 1], [], []>} : vector<8x256xbf16>, vector<256x128xbf16>, vector<8x128xf32> -> vector<8x128xf32>
    %c0_9 = arith.constant 0 : index
    %c0_10 = arith.constant 0 : index
    %11 = vector.load %arg5[%c0_9, %c0_10] : memref<1x128xf32, #tpu.memory_space<vmem>>, vector<1x128xf32>
    %12 = vector.broadcast %11 : vector<1x128xf32> to vector<8x128xf32>
    %13 = arith.addf %10, %12 : vector<8x128xf32>
    %c0_11 = arith.constant 0 : index
    %c0_12 = arith.constant 0 : index
    %14 = vector.load %arg6[%c0_11, %c0_12] : memref<8x128xf32, #tpu.memory_space<vmem>>, vector<8x128xf32>
    tpu.vector_store %arg6[%c0_11, %c0_12], %13 {strides = array<i32>} : memref<8x128xf32, #tpu.memory_space<vmem>>, vector<8x128xf32>,
    return
  }
  func.func @transform_0(%arg0: i32) -> (i32, i32) {
    %c0_i32 = arith.constant 0 : i32
    %c0_i32_0 = arith.constant 0 : i32
    return %arg0, %c0_i32 : i32, i32
  }
  func.func @transform_1(%arg0: i32) -> (i32, i32) {
    %c0_i32 = arith.constant 0 : i32
    %c0_i32_0 = arith.constant 0 : i32
    %c0_i32_1 = arith.constant 0 : i32
    return %c0_i32, %c0_i32_0 : i32, i32
  }
  func.func @transform_2(%arg0: i32) -> (i32, i32) {
    %c0_i32 = arith.constant 0 : i32
    %c0_i32_0 = arith.constant 0 : i32
    %c0_i32_1 = arith.constant 0 : i32
    return %c0_i32, %c0_i32_0 : i32, i32
  }
  func.func @transform_3(%arg0: i32) -> (i32, i32) {
    %c0_i32 = arith.constant 0 : i32
    %c0_i32_0 = arith.constant 0 : i32
    %c0_i32_1 = arith.constant 0 : i32
    return %c0_i32, %c0_i32_0 : i32, i32
  }
  func.func @transform_4(%arg0: i32) -> (i32, i32) {
    %c0_i32 = arith.constant 0 : i32
    %c0_i32_0 = arith.constant 0 : i32
    %c0_i32_1 = arith.constant 0 : i32
    return %c0_i32, %c0_i32_0 : i32, i32
  }
  func.func @transform_5(%arg0: i32) -> (i32, i32) {
    %c0_i32 = arith.constant 0 : i32
    %c0_i32_0 = arith.constant 0 : i32
    return %arg0, %c0_i32 : i32, i32
  }
}

</mosaic_0001>

<bundles_post_ra>
// kernel: encoder_forward.1
= control target key start
LH: loop header
LB: loop body
LE: loop exit
PB: predicated region body
PF: predicated region fallthrough
CT: control target
= control target key end

     0   :  { %10 = vsyncpa [#allocation3], 0  ;;  %s1763_s21 = smov [#allocation2]   ;;  %s1764_s23 = smov 128   ;;  %s1896_s0 = inlined_call_operand.vmem [shape: bf16[8,896], index: 0, kind: input, shape index: {}]   ;;  %s1897_s1 = inlined_call_operand.hbm [shape: bf16[896,256], index: 1, kind: input, shape index: {}]   ;;  %s1898_s2 = inlined_call_operand.vmem [shape: f32[1,256], index: 2, kind: input, shape index: {}]   ;;  %s1899_s3 = inlined_call_operand.vmem [shape: bf16[256,128], index: 3, kind: input, shape index: {}]   ;;  %s1900_s4 = inlined_call_operand.vmem [shape: f32[1,128], index: 4, kind: input, shape index: {}]   ;;  %s1901_s5 = inlined_call_operand.vmem [shape: f32[8,128], index: 5, kind: output, shape index: {}]  }
   0x1   :  { %s17_s20 = sshll.u32 %s1897_s1, 4  ;;  %s19_s22 = sshll.u32 %s1763_s21, 4  ;;  %s18_s20 = int_to_ptr.hbm [resolvable:$true] %s17_s20  ;;  %s20_s22 = int_to_ptr.vmem [resolvable:$true] %s19_s22 }
   0x2   :  { %s1765_s24 = smov 8  }
   0x3   :  { %25 = dma.hbm_to_vmem [thread:$0]  %s18_s20, 14336, %s20_s22, [#allocation3], %s1764_s23, %s1764_s23, %s1765_s24  }
   0x4   :  { %1761 = dma.done.wait [#allocation3], 14336  }
   0x5   :  { %1762 = vsyncadd [#allocation3], 4294952960  ;;  %v1151_v0 = vld [vmem:[#allocation2 + $0x70] sm:$0xf]  ;;  %v1620_v1 = vld [vmem:[#allocation2 + $0x74] sm:$0xf0] }
   0x6   :  { %v1215_v2 = vld [vmem:[#allocation2 + $0xf0] sm:$0xf]  ;;  %v1152_v3 = vor.u32 %v1620_v1, %v1151_v0  ;;  %v1636_v4 = vld [vmem:[#allocation2 + $0xf4] sm:$0xf0]  ;;  %v1143_v9 = vld [vmem:[#allocation2 + $0x60] sm:$0xf] }
   0x7   :  { %v1279_v5 = vld [vmem:[#allocation2 + $0x170] sm:$0xf]  ;;  %v1652_v6 = vld [vmem:[#allocation2 + $0x174] sm:$0xf0]  ;;  %v1216_v7 = vor.u32 %v1636_v4, %v1215_v2  ;;  %v1618_v10 = vld [vmem:[#allocation2 + $0x64] sm:$0xf0] }
   0x8   :  { %v1280_v8 = vor.u32 %v1652_v6, %v1279_v5  ;;  %v1207_v11 = vld [vmem:[#allocation2 + $0xe0] sm:$0xf]  ;;  %743 = vmatpush.bf16.msra.mxu0 %v1152_v3  ;;  %v1144_v12 = vor.u32 %v1618_v10, %v1143_v9  ;;  %v1634_v13 = vld [vmem:[#allocation2 + $0xe4] sm:$0xf0]  ;;  %v1135_v18 = vld [vmem:[#allocation2 + $0x50] sm:$0xf] }
   0x9   :  { %v1271_v14 = vld [vmem:[#allocation2 + $0x160] sm:$0xf]  ;;  %v1650_v15 = vld [vmem:[#allocation2 + $0x164] sm:$0xf0]  ;;  %756 = vmatpush.bf16.msra.mxu1 %v1216_v7  ;;  %v1208_v16 = vor.u32 %v1634_v13, %v1207_v11  ;;  %v1616_v19 = vld [vmem:[#allocation2 + $0x54] sm:$0xf0] }
   0xa   :  { %769 = vmatpush.bf16.msra.mxu2 %v1280_v8  ;;  %v1272_v17 = vor.u32 %v1650_v15, %v1271_v14  ;;  %v1199_v20 = vld [vmem:[#allocation2 + $0xd0] sm:$0xf]  ;;  %v1632_v21 = vld [vmem:[#allocation2 + $0xd4] sm:$0xf0]  ;;  %v1136_v24 = vor.u32 %v1616_v19, %v1135_v18  ;;  %v1127_v25 = vld [vmem:[#allocation2 + $0x40] sm:$0xf] }
   0xb   :  { %v1263_v22 = vld [vmem:[#allocation2 + $0x150] sm:$0xf]  ;;  %v1648_v23 = vld [vmem:[#allocation2 + $0x154] sm:$0xf0]  ;;  %v1614_v26 = vld [vmem:[#allocation2 + $0x44] sm:$0xf0]  ;;  %v1200_v27 = vor.u32 %v1632_v21, %v1199_v20 }
   0xc   :  { %744 = vmatpush.bf16.msra.mxu0 %v1144_v12  ;;  %v1264_v28 = vor.u32 %v1648_v23, %v1263_v22  ;;  %v1191_v29 = vld [vmem:[#allocation2 + $0xc0] sm:$0xf]  ;;  %v1343_v30 = vld [vmem:[#allocation2 + $0x1f0] sm:$0xf]  ;;  %v1668_v31 = vld [vmem:[#allocation2 + $0x1f4] sm:$0xf0]  ;;  %v1128_v37 = vor.u32 %v1614_v26, %v1127_v25 }
   0xd   :  { %757 = vmatpush.bf16.msra.mxu1 %v1208_v16  ;;  %v1630_v32 = vld [vmem:[#allocation2 + $0xc4] sm:$0xf0]  ;;  %v1255_v33 = vld [vmem:[#allocation2 + $0x140] sm:$0xf]  ;;  %v1344_v35 = vor.u32 %v1668_v31, %v1343_v30  ;;  %v1119_v38 = vld [vmem:[#allocation2 + $0x30] sm:$0xf] }
   0xe   :  { %770 = vmatpush.bf16.msra.mxu2 %v1272_v17  ;;  %v1646_v34 = vld [vmem:[#allocation2 + $0x144] sm:$0xf0]  ;;  %v1335_v36 = vld [vmem:[#allocation2 + $0x1e0] sm:$0xf]  ;;  %v1612_v39 = vld [vmem:[#allocation2 + $0x34] sm:$0xf0]  ;;  %v1192_v41 = vor.u32 %v1630_v32, %v1191_v29 }
   0xf   :  { %782 = vmatpush.bf16.msra.mxu3 %v1344_v35  ;;  %v1666_v40 = vld [vmem:[#allocation2 + $0x1e4] sm:$0xf0]  ;;  %v1256_v42 = vor.u32 %v1646_v34, %v1255_v33  ;;  %v1183_v43 = vld [vmem:[#allocation2 + $0xb0] sm:$0xf]  ;;  %v1628_v44 = vld [vmem:[#allocation2 + $0xb4] sm:$0xf0]  ;;  %v1120_v50 = vor.u32 %v1612_v39, %v1119_v38 }
  0x10   :  { %745 = vmatpush.bf16.msra.mxu0 %v1136_v24  ;;  %v1247_v45 = vld [vmem:[#allocation2 + $0x130] sm:$0xf]  ;;  %v1336_v46 = vor.u32 %v1666_v40, %v1335_v36  ;;  %v1644_v47 = vld [vmem:[#allocation2 + $0x134] sm:$0xf0]  ;;  %v1111_v51 = vld [vmem:[#allocation2 + $0x20] sm:$0xf]  ;;  %v1184_v54 = vor.u32 %v1628_v44, %v1183_v43 }
  0x11   :  { %758 = vmatpush.bf16.msra.mxu1 %v1200_v27  ;;  %v1327_v48 = vld [vmem:[#allocation2 + $0x1d0] sm:$0xf]  ;;  %v1664_v49 = vld [vmem:[#allocation2 + $0x1d4] sm:$0xf0]  ;;  %v1610_v52 = vld [vmem:[#allocation2 + $0x24] sm:$0xf0]  ;;  %v1248_v55 = vor.u32 %v1644_v47, %v1247_v45 }
  0x12   :  { %771 = vmatpush.bf16.msra.mxu2 %v1264_v28  ;;  %v1328_v53 = vor.u32 %v1664_v49, %v1327_v48  ;;  %v1175_v56 = vld [vmem:[#allocation2 + $0xa0] sm:$0xf]  ;;  %v1662_v58 = vld [vmem:[#allocation2 + $0x1c4] sm:$0xf0]  ;;  %v1112_v62 = vor.u32 %v1610_v52, %v1111_v51  ;;  %v1103_v63 = vld [vmem:[#allocation2 + $0x10] sm:$0xf] }
  0x13   :  { %783 = vmatpush.bf16.msra.mxu3 %v1336_v46  ;;  %v1319_v57 = vld [vmem:[#allocation2 + $0x1c0] sm:$0xf]  ;;  %v1626_v59 = vld [vmem:[#allocation2 + $0xa4] sm:$0xf0]  ;;  %v1608_v0 = vld [vmem:[#allocation2 + $0x14] sm:$0xf0] }
  0x14   :  { %746 = vmatpush.bf16.msra.mxu0 %v1128_v37  ;;  %v1239_v60 = vld [vmem:[#allocation2 + $0x120] sm:$0xf]  ;;  %v1642_v61 = vld [vmem:[#allocation2 + $0x124] sm:$0xf0]  ;;  %v1320_v1 = vor.u32 %v1662_v58, %v1319_v57  ;;  %v1176_v2 = vor.u32 %v1626_v59, %v1175_v56  ;;  %v1167_v4 = vld [vmem:[#allocation2 + $0x90] sm:$0xf]  ;;  %v1104_v10 = vor.u32 %v1608_v0, %v1103_v63 }
  0x15   :  { %759 = vmatpush.bf16.msra.mxu1 %v1192_v41  ;;  %v1240_v3 = vor.u32 %v1642_v61, %v1239_v60  ;;  %v1311_v5 = vld [vmem:[#allocation2 + $0x1b0] sm:$0xf]  ;;  %v1660_v6 = vld [vmem:[#allocation2 + $0x1b4] sm:$0xf0]  ;;  %v1095_v11 = vld [vmem:[#allocation2] sm:$0xf] }
  0x16   :  { %772 = vmatpush.bf16.msra.mxu2 %v1256_v42  ;;  %v1624_v7 = vld [vmem:[#allocation2 + $0x94] sm:$0xf0]  ;;  %v1231_v8 = vld [vmem:[#allocation2 + $0x110] sm:$0xf]  ;;  %v1606_v12 = vld [vmem:[#allocation2 + $0x4] sm:$0xf0]  ;;  %v1312_v14 = vor.u32 %v1660_v6, %v1311_v5 }
  0x17   :  { %784 = vmatpush.bf16.msra.mxu3 %v1328_v53  ;;  %v1640_v9 = vld [vmem:[#allocation2 + $0x114] sm:$0xf0]  ;;  %v1159_v13 = vld [vmem:[#allocation2 + $0x80] sm:$0xf]  ;;  %v1168_v15 = vor.u32 %v1624_v7, %v1167_v4  ;;  %v1622_v17 = vld [vmem:[#allocation2 + $0x84] sm:$0xf0]  ;;  %v1096_v26 = vor.u32 %v1606_v12, %v1095_v11 }
  0x18   :  { %747 = vmatpush.bf16.msra.mxu0 %v1120_v50  ;;  %v1232_v16 = vor.u32 %v1640_v9, %v1231_v8  ;;  %v1303_v18 = vld [vmem:[#allocation2 + $0x1a0] sm:$0xf]  ;;  %v1658_v19 = vld [vmem:[#allocation2 + $0x1a4] sm:$0xf0]  ;;  %v1407_v22 = vld [vmem:[#allocation2 + $0x270] sm:$0xf]  ;;  %v1160_v30 = vor.u32 %v1622_v17, %v1159_v13 }
  0x19   :  { %760 = vmatpush.bf16.msra.mxu1 %v1184_v54  ;;  %v1223_v20 = vld [vmem:[#allocation2 + $0x100] sm:$0xf]  ;;  %v1638_v21 = vld [vmem:[#allocation2 + $0x104] sm:$0xf0]  ;;  %v1684_v23 = vld [vmem:[#allocation2 + $0x274] sm:$0xf0]  ;;  %v1304_v29 = vor.u32 %v1658_v19, %v1303_v18 }
  0x1a   :  { %773 = vmatpush.bf16.msra.mxu2 %v1248_v55  ;;  %v1471_v24 = vld [vmem:[#allocation2 + $0x2f0] sm:$0xf]  ;;  %v1700_v25 = vld [vmem:[#allocation2 + $0x2f4] sm:$0xf0]  ;;  %v1224_v31 = vor.u32 %v1638_v21, %v1223_v20  ;;  %v1408_v34 = vor.u32 %v1684_v23, %v1407_v22  ;;  %v1399_v36 = vld [vmem:[#allocation2 + $0x260] sm:$0xf] }
  0x1b   :  { %785 = vmatpush.bf16.msra.mxu3 %v1320_v1  ;;  %v1535_v27 = vld [vmem:[#allocation2 + $0x370] sm:$0xf]  ;;  %v1716_v28 = vld [vmem:[#allocation2 + $0x374] sm:$0xf0]  ;;  %v1472_v35 = vor.u32 %v1700_v25, %v1471_v24  ;;  %v1682_v37 = vld [vmem:[#allocation2 + $0x264] sm:$0xf0] }
  0x1c   :  { %748 = vmatpush.bf16.msra.mxu0 %v1112_v62  ;;  %v1295_v32 = vld [vmem:[#allocation2 + $0x190] sm:$0xf]  ;;  %v1656_v33 = vld [vmem:[#allocation2 + $0x194] sm:$0xf0]  ;;  %v1536_v38 = vor.u32 %v1716_v28, %v1535_v27  ;;  %v1463_v39 = vld [vmem:[#allocation2 + $0x2e0] sm:$0xf]  ;;  %v1400_v46 = vor.u32 %v1682_v37, %v1399_v36 }
  0x1d   :  { %761 = vmatpush.bf16.msra.mxu1 %v1176_v2  ;;  %v1698_v40 = vld [vmem:[#allocation2 + $0x2e4] sm:$0xf0]  ;;  %v1527_v42 = vld [vmem:[#allocation2 + $0x360] sm:$0xf]  ;;  %v1296_v44 = vor.u32 %v1656_v33, %v1295_v32  ;;  %v1391_v51 = vld [vmem:[#allocation2 + $0x250] sm:$0xf] }
  0x1e   :  { %774 = vmatpush.bf16.msra.mxu2 %v1240_v3  ;;  %v37_v41 = vld [vmem:[%s1896_s0 + $0x8] sm:$0xff]  ;;  %v1287_v47 = vld [vmem:[#allocation2 + $0x180] sm:$0xf]  ;;  %v1464_v50 = vor.u32 %v1698_v40, %v1463_v39  ;;  %v1619_v52 = vld [vmem:[#allocation2 + $0x74] sm:$0xf] }
  0x1f   :  { %786 = vmatpush.bf16.msra.mxu3 %v1312_v14  ;;  %v1714_v43 = vld [vmem:[#allocation2 + $0x364] sm:$0xf0]  ;;  %v164_v45 = vunpack.c.l.b16 %v37_v41  ;;  %v36_v49 = vld [vmem:[%s1896_s0] sm:$0xff]  ;;  %v1153_v53 = vld [vmem:[#allocation2 + $0x78] sm:$0xf0]  ;;  %v165_v61 = vunpack.c.h.b16 %v37_v41 }
  0x20   :  { %749 = vmatpush.bf16.msra.mxu0 %v1104_v10  ;;  %v1654_v48 = vld [vmem:[#allocation2 + $0x184] sm:$0xf0]  ;;  %v162_v55 = vunpack.c.l.b16 %v36_v49  ;;  %v163_v56 = vunpack.c.h.b16 %v36_v49  ;;  %v1528_v57 = vor.u32 %v1714_v43, %v1527_v42  ;;  %v1680_v58 = vld [vmem:[#allocation2 + $0x254] sm:$0xf0]  ;;  %v1455_v59 = vld [vmem:[#allocation2 + $0x2d0] sm:$0xf]  ;;  %v1156_v3 = vor.u32 %v1619_v52, %v1153_v53 }
  0x21   :  { %762 = vmatpush.bf16.msra.mxu1 %v1168_v15  ;;  %v1805_v54 = vpack.c.b16 %v164_v45, %v164_v45  ;;  %v1696_v60 = vld [vmem:[#allocation2 + $0x2d4] sm:$0xf0]  ;;  %v1519_v62 = vld [vmem:[#allocation2 + $0x350] sm:$0xf]  ;;  %v1288_v0 = vor.u32 %v1654_v48, %v1287_v47  ;;  %v1392_v4 = vor.u32 %v1680_v58, %v1391_v51  ;;  %v1383_v6 = vld [vmem:[#allocation2 + $0x240] sm:$0xf]  ;;  %v1813_v13 = vpack.c.b16 %v165_v61, %v165_v61 }
  0x22   :  { %775 = vmatpush.bf16.msra.mxu2 %v1232_v16  ;;  %v1712_v63 = vld [vmem:[#allocation2 + $0x354] sm:$0xf0]  ;;  %v1808_v1 = vpack.c.b16 %v162_v55, %v162_v55  ;;  %v1810_v2 = vpack.c.b16 %v163_v56, %v163_v56  ;;  %v1456_v5 = vor.u32 %v1696_v60, %v1455_v59  ;;  %v1617_v7 = vld [vmem:[#allocation2 + $0x64] sm:$0xf]  ;;  %v1145_v8 = vld [vmem:[#allocation2 + $0x68] sm:$0xf0] }
  0x23   :  { %787 = vmatpush.bf16.msra.mxu3 %v1304_v29  ;;  %v1520_v9 = vor.u32 %v1712_v63, %v1519_v62  ;;  %v1678_v10 = vld [vmem:[#allocation2 + $0x244] sm:$0xf0]  ;;  %v1447_v11 = vld [vmem:[#allocation2 + $0x2c0] sm:$0xf]  ;;  %v1148_v16 = vor.u32 %v1617_v7, %v1145_v8  ;;  %v1375_v19 = vld [vmem:[#allocation2 + $0x230] sm:$0xf] }
  0x24   :  { %750 = vmatpush.bf16.msra.mxu0 %v1096_v26  ;;  %v1694_v12 = vld [vmem:[#allocation2 + $0x2c4] sm:$0xf0]  ;;  %v1511_v14 = vld [vmem:[#allocation2 + $0x340] sm:$0xf]  ;;  %v1384_v17 = vor.u32 %v1678_v10, %v1383_v6  ;;  %v1615_v20 = vld [vmem:[#allocation2 + $0x54] sm:$0xf] }
  0x25   :  { %763 = vmatpush.bf16.msra.mxu1 %v1160_v30  ;;  %v1710_v15 = vld [vmem:[#allocation2 + $0x344] sm:$0xf0]  ;;  %v1448_v18 = vor.u32 %v1694_v12, %v1447_v11  ;;  %v1137_v21 = vld [vmem:[#allocation2 + $0x58] sm:$0xf0]  ;;  %v1676_v23 = vld [vmem:[#allocation2 + $0x234] sm:$0xf0] }
  0x26   :  { %776 = vmatpush.bf16.msra.mxu2 %v1224_v31  ;;  %v1512_v22 = vor.u32 %v1710_v15, %v1511_v14  ;;  %v1439_v24 = vld [vmem:[#allocation2 + $0x2b0] sm:$0xf]  ;;  %v1692_v25 = vld [vmem:[#allocation2 + $0x2b4] sm:$0xf0]  ;;  %v1140_v28 = vor.u32 %v1615_v20, %v1137_v21  ;;  %v1376_v29 = vor.u32 %v1676_v23, %v1375_v19  ;;  %v1367_v31 = vld [vmem:[#allocation2 + $0x220] sm:$0xf] }
  0x27   :  { %788 = vmatpush.bf16.msra.mxu3 %v1296_v44  ;;  %751 = vmatmul.bf16.vlgmr.msra.gmra.mxu0 %v1808_v1  ;;  %v1503_v26 = vld [vmem:[#allocation2 + $0x330] sm:$0xf]  ;;  %v1708_v27 = vld [vmem:[#allocation2 + $0x334] sm:$0xf0]  ;;  %v1440_v30 = vor.u32 %v1692_v25, %v1439_v24  ;;  %v1613_v32 = vld [vmem:[#allocation2 + $0x44] sm:$0xf] }
  0x28   :  { %795 = vmatpush.bf16.msrb.mxu0 %v1408_v34  ;;  %764 = vmatmul.bf16.vlgmr.msra.gmra.mxu1 %v1810_v2  ;;  %v1129_v33 = vld [vmem:[#allocation2 + $0x48] sm:$0xf0]  ;;  %v1504_v34 = vor.u32 %v1708_v27, %v1503_v26  ;;  %v1431_v36 = vld [vmem:[#allocation2 + $0x2a0] sm:$0xf]  ;;  %v1690_v37 = vld [vmem:[#allocation2 + $0x2a4] sm:$0xf0] }
  0x29   :  { %808 = vmatpush.bf16.msrb.mxu1 %v1472_v35  ;;  %777 = vmatmul.bf16.vlgmr.msra.gmra.mxu2 %v1805_v54  ;;  %v1674_v35 = vld [vmem:[#allocation2 + $0x224] sm:$0xf0]  ;;  %v1132_v40 = vor.u32 %v1613_v32, %v1129_v33  ;;  %v1432_v42 = vor.u32 %v1690_v37, %v1431_v36  ;;  %v1359_v43 = vld [vmem:[#allocation2 + $0x210] sm:$0xf]  ;;  %v1611_v44 = vld [vmem:[#allocation2 + $0x34] sm:$0xf] }
  0x2a   :  { %821 = vmatpush.bf16.msrb.mxu2 %v1536_v38  ;;  %v1495_v38 = vld [vmem:[#allocation2 + $0x320] sm:$0xf]  ;;  %v1706_v39 = vld [vmem:[#allocation2 + $0x324] sm:$0xf0]  ;;  %v1368_v41 = vor.u32 %v1674_v35, %v1367_v31  ;;  %v1121_v45 = vld [vmem:[#allocation2 + $0x38] sm:$0xf0] }
  0x2b   :  { %789 = vmatpush.bf16.msra.mxu3 %v1288_v0  ;;  %v1672_v47 = vld [vmem:[#allocation2 + $0x214] sm:$0xf0]  ;;  %v1423_v48 = vld [vmem:[#allocation2 + $0x290] sm:$0xf]  ;;  %v1351_v52 = vld [vmem:[#allocation2 + $0x200] sm:$0xf] }
  0x2c   :  { %796 = vmatpush.bf16.msrb.mxu0 %v1400_v46  ;;  %v1496_v46 = vor.u32 %v1706_v39, %v1495_v38  ;;  %v1688_v49 = vld [vmem:[#allocation2 + $0x294] sm:$0xf0]  ;;  %v1670_v53 = vld [vmem:[#allocation2 + $0x204] sm:$0xf0]  ;;  %v1415_v55 = vld [vmem:[#allocation2 + $0x280] sm:$0xf]  ;;  %v1360_v58 = vor.u32 %v1672_v47, %v1359_v43 }
  0x2d   :  { %809 = vmatpush.bf16.msrb.mxu1 %v1464_v50  ;;  %v1487_v50 = vld [vmem:[#allocation2 + $0x310] sm:$0xf]  ;;  %v1704_v51 = vld [vmem:[#allocation2 + $0x314] sm:$0xf0]  ;;  %v1686_v56 = vld [vmem:[#allocation2 + $0x284] sm:$0xf0]  ;;  %v1424_v59 = vor.u32 %v1688_v49, %v1423_v48  ;;  %v1352_v15 = vor.u32 %v1670_v53, %v1351_v52 }
  0x2e   :  { %822 = vmatpush.bf16.msrb.mxu2 %v1528_v57  ;;  %790 = vmatmul.bf16.vlgmr.msra.gmra.mxu3 %v1813_v13  ;;  %v1124_v57 = vor.u32 %v1611_v44, %v1121_v45  ;;  %v38_v60 = vld [vmem:[%s1896_s0 + $0x10] sm:$0xff]  ;;  %v1609_v61 = vld [vmem:[#allocation2 + $0x24] sm:$0xf]  ;;  %v1113_v62 = vld [vmem:[#allocation2 + $0x28] sm:$0xf0]  ;;  %v1488_v63 = vor.u32 %v1704_v51, %v1487_v50 }
  0x2f   :  { %834 = vmatpush.bf16.msrb.mxu3 %v1156_v3  ;;  %v1479_v0 = vld [vmem:[#allocation2 + $0x300] sm:$0xf]  ;;  %v1702_v3 = vld [vmem:[#allocation2 + $0x304] sm:$0xf0]  ;;  %v1217_v6 = vld [vmem:[#allocation2 + $0xf8] sm:$0xf0]  ;;  %v1116_v10 = vor.u32 %v1609_v61, %v1113_v62  ;;  %v167_v11 = vunpack.c.h.b16 %v38_v60 }
  0x30   :  { %797 = vmatpush.bf16.msrb.mxu0 %v1392_v4  ;;  %v39_v4 = vld [vmem:[%s1896_s0 + $0x18] sm:$0xf]  ;;  %v1651_v7 = vld [vmem:[#allocation2 + $0x174] sm:$0xf]  ;;  %v1281_v8 = vld [vmem:[#allocation2 + $0x178] sm:$0xf0] }
  0x31   :  { %810 = vmatpush.bf16.msrb.mxu1 %v1456_v5  ;;  %v1635_v5 = vld [vmem:[#allocation2 + $0xf4] sm:$0xf]  ;;  %v1345_v14 = vld [vmem:[#allocation2 + $0x1f8] sm:$0xf0]  ;;  %v1633_v23 = vld [vmem:[#allocation2 + $0xe4] sm:$0xf] }
  0x32   :  { %823 = vmatpush.bf16.msrb.mxu2 %v1520_v9  ;;  %v166_v9 = vunpack.c.l.b16 %v38_v60  ;;  %v1667_v12 = vld [vmem:[#allocation2 + $0x1f4] sm:$0xf]  ;;  %v1220_v19 = vor.u32 %v1635_v5, %v1217_v6  ;;  %v1105_v21 = vld [vmem:[#allocation2 + $0x18] sm:$0xf0]  ;;  %v1209_v24 = vld [vmem:[#allocation2 + $0xe8] sm:$0xf0] }
  0x33   :  { %835 = vmatpush.bf16.msrb.mxu3 %v1148_v16  ;;  %v1416_v16 = vor.u32 %v1686_v56, %v1415_v55  ;;  %v1607_v20 = vld [vmem:[#allocation2 + $0x14] sm:$0xf]  ;;  %v1649_v25 = vld [vmem:[#allocation2 + $0x164] sm:$0xf]  ;;  %v1348_v26 = vor.u32 %v1667_v12, %v1345_v14  ;;  %v1337_v31 = vld [vmem:[#allocation2 + $0x1e8] sm:$0xf0]  ;;  %v1212_v35 = vor.u32 %v1633_v23, %v1209_v24 }
  0x34   :  { %798 = vmatpush.bf16.msrb.mxu0 %v1384_v17  ;;  %v168_v17 = vunpack.c.l.b16 %v39_v4  ;;  %v1823_v27 = vpack.c.b16 %v166_v9, %v166_v9  ;;  %v1108_v33 = vor.u32 %v1607_v20, %v1105_v21  ;;  %v1201_v36 = vld [vmem:[#allocation2 + $0xd8] sm:$0xf0]  ;;  %v1605_v37 = vld [vmem:[#allocation2 + $0x4] sm:$0xf]  ;;  %v1097_v38 = vld [vmem:[#allocation2 + $0x8] sm:$0xf0] }
  0x35   :  { %811 = vmatpush.bf16.msrb.mxu1 %v1448_v18  ;;  %v1480_v18 = vor.u32 %v1702_v3, %v1479_v0  ;;  %v1265_v44 = vld [vmem:[#allocation2 + $0x158] sm:$0xf0]  ;;  %v1663_v45 = vld [vmem:[#allocation2 + $0x1d4] sm:$0xf]  ;;  %v1100_v47 = vor.u32 %v1605_v37, %v1097_v38  ;;  %v1629_v49 = vld [vmem:[#allocation2 + $0xc4] sm:$0xf] }
  0x36   :  { %824 = vmatpush.bf16.msrb.mxu2 %v1512_v22  ;;  %v1284_v22 = vor.u32 %v1651_v7, %v1281_v8  ;;  %v1827_v32 = vpack.c.b16 %v168_v17, %v168_v17  ;;  %v1193_v50 = vld [vmem:[#allocation2 + $0xc8] sm:$0xf0]  ;;  %v1645_v53 = vld [vmem:[#allocation2 + $0x144] sm:$0xf]  ;;  %v1627_v62 = vld [vmem:[#allocation2 + $0xb4] sm:$0xf] }
  0x37   :  { %836 = vmatpush.bf16.msrb.mxu3 %v1140_v28  ;;  %v1273_v28 = vld [vmem:[#allocation2 + $0x168] sm:$0xf0]  ;;  %v1681_v55 = vld [vmem:[#allocation2 + $0x264] sm:$0xf]  ;;  %v1196_v61 = vor.u32 %v1629_v49, %v1193_v50  ;;  %v1643_v4 = vld [vmem:[#allocation2 + $0x134] sm:$0xf] }
  0x38   :  { %799 = vmatpush.bf16.msrb.mxu0 %v1376_v29  ;;  %v1825_v29 = vpack.c.b16 %v167_v11, %v167_v11  ;;  %v1276_v39 = vor.u32 %v1649_v25, %v1273_v28  ;;  %v1401_v56 = vld [vmem:[#allocation2 + $0x268] sm:$0xf0]  ;;  %v1679_v5 = vld [vmem:[#allocation2 + $0x254] sm:$0xf]  ;;  %v1393_v6 = vld [vmem:[#allocation2 + $0x258] sm:$0xf0] }
  0x39   :  { %812 = vmatpush.bf16.msrb.mxu1 %v1440_v30  ;;  %v1665_v30 = vld [vmem:[#allocation2 + $0x1e4] sm:$0xf]  ;;  %v1321_v60 = vld [vmem:[#allocation2 + $0x1c8] sm:$0xf0]  ;;  %v1404_v0 = vor.u32 %v1681_v55, %v1401_v56  ;;  %v1249_v8 = vld [vmem:[#allocation2 + $0x138] sm:$0xf0] }
  0x3a   :  { %825 = vmatpush.bf16.msrb.mxu2 %v1504_v34  ;;  %v1631_v34 = vld [vmem:[#allocation2 + $0xd4] sm:$0xf]  ;;  %v1340_v43 = vor.u32 %v1665_v30, %v1337_v31  ;;  %v1625_v12 = vld [vmem:[#allocation2 + $0xa4] sm:$0xf]  ;;  %v1177_v14 = vld [vmem:[#allocation2 + $0xa8] sm:$0xf0] }
  0x3b   :  { %837 = vmatpush.bf16.msrb.mxu3 %v1132_v40  ;;  %v1647_v40 = vld [vmem:[#allocation2 + $0x154] sm:$0xf]  ;;  %v1204_v48 = vor.u32 %v1631_v34, %v1201_v36  ;;  %v1641_v17 = vld [vmem:[#allocation2 + $0x124] sm:$0xf]  ;;  %v1241_v21 = vld [vmem:[#allocation2 + $0x128] sm:$0xf0]  ;;  %v1180_v24 = vor.u32 %v1625_v12, %v1177_v14 }
  0x3c   :  { %800 = vmatpush.bf16.msrb.mxu0 %v1368_v41  ;;  %v1683_v41 = vld [vmem:[#allocation2 + $0x274] sm:$0xf]  ;;  %v1268_v52 = vor.u32 %v1647_v40, %v1265_v44  ;;  %v1305_v23 = vld [vmem:[#allocation2 + $0x1a8] sm:$0xf0]  ;;  %v1169_v25 = vld [vmem:[#allocation2 + $0x98] sm:$0xf0]  ;;  %v1244_v28 = vor.u32 %v1641_v17, %v1241_v21 }
  0x3d   :  { %813 = vmatpush.bf16.msrb.mxu1 %v1432_v42  ;;  %v1409_v42 = vld [vmem:[#allocation2 + $0x278] sm:$0xf0]  ;;  %v1659_v9 = vld [vmem:[#allocation2 + $0x1b4] sm:$0xf]  ;;  %v1161_v40 = vld [vmem:[#allocation2 + $0x88] sm:$0xf0] }
  0x3e   :  { %826 = vmatpush.bf16.msrb.mxu2 %v1496_v46  ;;  %v1329_v46 = vld [vmem:[#allocation2 + $0x1d8] sm:$0xf0]  ;;  %v1412_v51 = vor.u32 %v1683_v41, %v1409_v42  ;;  %v1639_v30 = vld [vmem:[#allocation2 + $0x114] sm:$0xf]  ;;  %v1637_v41 = vld [vmem:[#allocation2 + $0x104] sm:$0xf] }
  0x3f   :  { %838 = vmatpush.bf16.msrb.mxu3 %v1124_v57  ;;  %v1332_v57 = vor.u32 %v1663_v45, %v1329_v46  ;;  %v1675_v31 = vld [vmem:[#allocation2 + $0x234] sm:$0xf]  ;;  %v1297_v37 = vld [vmem:[#allocation2 + $0x198] sm:$0xf0]  ;;  %v1225_v44 = vld [vmem:[#allocation2 + $0x108] sm:$0xf0] }
  0x40   :  { %801 = vmatpush.bf16.msrb.mxu0 %v1360_v58  ;;  %v1257_v58 = vld [vmem:[#allocation2 + $0x148] sm:$0xf0]  ;;  %v1655_v36 = vld [vmem:[#allocation2 + $0x194] sm:$0xf]  ;;  %v1673_v45 = vld [vmem:[#allocation2 + $0x224] sm:$0xf] }
  0x41   :  { %814 = vmatpush.bf16.msrb.mxu1 %v1424_v59  ;;  %v1661_v59 = vld [vmem:[#allocation2 + $0x1c4] sm:$0xf]  ;;  %v1260_v3 = vor.u32 %v1645_v53, %v1257_v58  ;;  %v1369_v46 = vld [vmem:[#allocation2 + $0x228] sm:$0xf0]  ;;  %v1473_v49 = vld [vmem:[#allocation2 + $0x2f8] sm:$0xf0] }
  0x42   :  { %827 = vmatpush.bf16.msrb.mxu2 %v1488_v63  ;;  %v1185_v63 = vld [vmem:[#allocation2 + $0xb8] sm:$0xf0]  ;;  %v1324_v7 = vor.u32 %v1661_v59, %v1321_v60  ;;  %v1715_v50 = vld [vmem:[#allocation2 + $0x374] sm:$0xf]  ;;  %v1289_v53 = vld [vmem:[#allocation2 + $0x188] sm:$0xf0]  ;;  %v1372_v56 = vor.u32 %v1673_v45, %v1369_v46 }
  0x43   :  { %839 = vmatpush.bf16.msrb.mxu3 %v1116_v10  ;;  %v1313_v10 = vld [vmem:[#allocation2 + $0x1b8] sm:$0xf0]  ;;  %v1188_v11 = vor.u32 %v1627_v62, %v1185_v63  ;;  %v1671_v59 = vld [vmem:[#allocation2 + $0x214] sm:$0xf]  ;;  %v1697_v62 = vld [vmem:[#allocation2 + $0x2e4] sm:$0xf] }
  0x44   :  { %802 = vmatpush.bf16.msrb.mxu0 %v1352_v15  ;;  %v1396_v15 = vor.u32 %v1679_v5, %v1393_v6  ;;  %v1316_v20 = vor.u32 %v1659_v9, %v1313_v10  ;;  %v1361_v60 = vld [vmem:[#allocation2 + $0x218] sm:$0xf0]  ;;  %v1465_v63 = vld [vmem:[#allocation2 + $0x2e8] sm:$0xf0]  ;;  %v1711_v14 = vld [vmem:[#allocation2 + $0x354] sm:$0xf] }
  0x45   :  { %815 = vmatpush.bf16.msrb.mxu1 %v1416_v16  ;;  %v1252_v16 = vor.u32 %v1643_v4, %v1249_v8  ;;  %v1529_v4 = vld [vmem:[#allocation2 + $0x368] sm:$0xf0]  ;;  %v1364_v5 = vor.u32 %v1671_v59, %v1361_v60  ;;  %v1468_v6 = vor.u32 %v1697_v62, %v1465_v63  ;;  %v1724_v9 = vld [vmem:[%s1899_s3 + $0x38] sm:$0xff]  ;;  %v1709_v21 = vld [vmem:[#allocation2 + $0x344] sm:$0xf] }
  0x46   :  { %828 = vmatpush.bf16.msrb.mxu2 %v1480_v18  ;;  %v1677_v18 = vld [vmem:[#allocation2 + $0x244] sm:$0xf]  ;;  %v1353_v8 = vld [vmem:[#allocation2 + $0x208] sm:$0xf0]  ;;  %v1457_v12 = vld [vmem:[#allocation2 + $0x2d8] sm:$0xf0] }
  0x47   :  { %803 = vmatmul.bf16.vlgmr.msrb.gmra.mxu0 %v1823_v27  ;;  %840 = vmatpush.bf16.msrb.mxu3 %v1108_v33  ;;  %v1377_v33 = vld [vmem:[#allocation2 + $0x238] sm:$0xf0] }
  0x48   :  { %847 = vmatpush.bf16.msra.mxu0 %v1220_v19  ;;  %816 = vmatmul.bf16.vlgmr.msrb.gmra.mxu1 %v1825_v29  ;;  %v1385_v19 = vld [vmem:[#allocation2 + $0x248] sm:$0xf0]  ;;  %v1380_v42 = vor.u32 %v1675_v31, %v1377_v33  ;;  %v1705_v31 = vld [vmem:[#allocation2 + $0x324] sm:$0xf] }
  0x49   :  { %860 = vmatpush.bf16.msra.mxu1 %v1284_v22  ;;  %829 = vmatmul.bf16.vlgmr.msrb.gmra.mxu2 %v1827_v32  ;;  %v1657_v22 = vld [vmem:[#allocation2 + $0x1a4] sm:$0xf]  ;;  %v1497_v33 = vld [vmem:[#allocation2 + $0x328] sm:$0xf0] }
  0x4a   :  { %873 = vmatpush.bf16.msra.mxu2 %v1348_v26  ;;  %v1388_v26 = vor.u32 %v1677_v18, %v1385_v19  ;;  %v1308_v34 = vor.u32 %v1657_v22, %v1305_v23  ;;  %v1693_v19 = vld [vmem:[#allocation2 + $0x2c4] sm:$0xf]  ;;  %v1513_v22 = vld [vmem:[#allocation2 + $0x348] sm:$0xf0] }
  0x4b   :  { %841 = vmatpush.bf16.msrb.mxu3 %v1100_v47  ;;  %v1300_v47 = vor.u32 %v1655_v36, %v1297_v37  ;;  %v1516_v23 = vor.u32 %v1709_v21, %v1513_v22  ;;  %v1687_v36 = vld [vmem:[#allocation2 + $0x294] sm:$0xf]  ;;  %v1425_v37 = vld [vmem:[#allocation2 + $0x298] sm:$0xf0] }
  0x4c   :  { %848 = vmatpush.bf16.msra.mxu0 %v1212_v35  ;;  %v1233_v35 = vld [vmem:[#allocation2 + $0x118] sm:$0xf0] }
  0x4d   :  { %861 = vmatpush.bf16.msra.mxu1 %v1276_v39  ;;  %v1621_v39 = vld [vmem:[#allocation2 + $0x84] sm:$0xf]  ;;  %v1728_v21 = vld [vmem:[%s1899_s3 + $0x58] sm:$0xff] }
  0x4e   :  { %874 = vmatpush.bf16.msra.mxu2 %v1340_v43  ;;  %842 = vmatmul.bf16.vlgmr.msrb.gmra.mxu3 %v1808_v1  ;;  %v1623_v1 = vld [vmem:[#allocation2 + $0x94] sm:$0xf]  ;;  %v1236_v43 = vor.u32 %v1639_v30, %v1233_v35  ;;  %v1164_v55 = vor.u32 %v1621_v39, %v1161_v40  ;;  %v1433_v30 = vld [vmem:[#allocation2 + $0x2a8] sm:$0xf0]  ;;  %v1500_v35 = vor.u32 %v1705_v31, %v1497_v33  ;;  %v1489_v39 = vld [vmem:[#allocation2 + $0x318] sm:$0xf0] }
  0x4f   :  { %886 = vmatpush.bf16.msra.mxu3 %v1412_v51  ;;  %v1172_v38 = vor.u32 %v1623_v1, %v1169_v25  ;;  %v1537_v51 = vld [vmem:[#allocation2 + $0x378] sm:$0xf0] }
  0x50   :  { %849 = vmatpush.bf16.msra.mxu0 %v1204_v48  ;;  %v1699_v48 = vld [vmem:[#allocation2 + $0x2f4] sm:$0xf]  ;;  %v1441_v1 = vld [vmem:[#allocation2 + $0x2b8] sm:$0xf0] }
  0x51   :  { %862 = vmatpush.bf16.msra.mxu1 %v1268_v52  ;;  %v1653_v52 = vld [vmem:[#allocation2 + $0x184] sm:$0xf]  ;;  %v1476_v58 = vor.u32 %v1699_v48, %v1473_v49  ;;  %v1505_v25 = vld [vmem:[#allocation2 + $0x338] sm:$0xf0]  ;;  %v1722_v48 = vld [vmem:[%s1899_s3 + $0x28] sm:$0xff] }
  0x52   :  { %875 = vmatpush.bf16.msra.mxu2 %v1332_v57  ;;  %v1228_v57 = vor.u32 %v1637_v41, %v1225_v44  ;;  %v1685_v41 = vld [vmem:[#allocation2 + $0x284] sm:$0xf]  ;;  %v1481_v44 = vld [vmem:[#allocation2 + $0x308] sm:$0xf0] }
  0x53   :  { %887 = vmatpush.bf16.msra.mxu3 %v1404_v0  ;;  %v1292_v0 = vor.u32 %v1653_v52, %v1289_v53  ;;  %v1721_v49 = vld [vmem:[%s1899_s3 + $0x20] sm:$0xff] }
  0x54   :  { %850 = vmatpush.bf16.msra.mxu0 %v1196_v61  ;;  %v1540_v61 = vor.u32 %v1715_v50, %v1537_v51  ;;  %v1718_v50 = vld [vmem:[%s1899_s3 + $0x8] sm:$0xff] }
  0x55   :  { %863 = vmatpush.bf16.msra.mxu1 %v1260_v3  ;;  %v1713_v3 = vld [vmem:[#allocation2 + $0x364] sm:$0xf] }
  0x56   :  { %876 = vmatpush.bf16.msra.mxu2 %v1324_v7  ;;  %v1669_v7 = vld [vmem:[#allocation2 + $0x204] sm:$0xf]  ;;  %v1532_v10 = vor.u32 %v1713_v3, %v1529_v4 }
  0x57   :  { %888 = vmatpush.bf16.msra.mxu3 %v1396_v15  ;;  %v1521_v15 = vld [vmem:[#allocation2 + $0x358] sm:$0xf0] }
  0x58   :  { %851 = vmatpush.bf16.msra.mxu0 %v1188_v11  ;;  %v1695_v11 = vld [vmem:[#allocation2 + $0x2d4] sm:$0xf]  ;;  %v1524_v18 = vor.u32 %v1711_v14, %v1521_v15 }
  0x59   :  { %864 = vmatpush.bf16.msra.mxu1 %v1252_v16  ;;  %v1356_v16 = vor.u32 %v1669_v7, %v1353_v8  ;;  %v1460_v17 = vor.u32 %v1695_v11, %v1457_v12  ;;  %v1732_v7 = vld [vmem:[%s1899_s3 + $0x78] sm:$0xff]  ;;  %v1730_v11 = vld [vmem:[%s1899_s3 + $0x68] sm:$0xff] }
  0x5a   :  { %877 = vmatpush.bf16.msra.mxu2 %v1316_v20  ;;  %v1449_v20 = vld [vmem:[#allocation2 + $0x2c8] sm:$0xf0] }
  0x5b   :  { %889 = vmatpush.bf16.msra.mxu3 %v1388_v26 }
  0x5c   :  { %852 = vmatpush.bf16.msra.mxu0 %v1180_v24  ;;  %v1691_v24 = vld [vmem:[#allocation2 + $0x2b4] sm:$0xf] }
  0x5d   :  { %865 = vmatpush.bf16.msra.mxu1 %v1244_v28  ;;  %v1444_v26 = vor.u32 %v1691_v24, %v1441_v1  ;;  %v1689_v28 = vld [vmem:[#allocation2 + $0x2a4] sm:$0xf]  ;;  %v1726_v24 = vld [vmem:[%s1899_s3 + $0x48] sm:$0xff] }
  0x5e   :  { %878 = vmatpush.bf16.msra.mxu2 %v1308_v34  ;;  %v1436_v34 = vor.u32 %v1689_v28, %v1433_v30 }
  0x5f   :  { %890 = vmatpush.bf16.msra.mxu3 %v1380_v42  ;;  %v1417_v42 = vld [vmem:[#allocation2 + $0x288] sm:$0xf0] }
  0x60   :  { %853 = vmatpush.bf16.msra.mxu0 %v1172_v38  ;;  %v1703_v38 = vld [vmem:[#allocation2 + $0x314] sm:$0xf]  ;;  %v1420_v45 = vor.u32 %v1685_v41, %v1417_v42 }
  0x61   :  { %866 = vmatpush.bf16.msra.mxu1 %v1236_v43  ;;  %v1492_v40 = vor.u32 %v1703_v38, %v1489_v39  ;;  %v1701_v43 = vld [vmem:[#allocation2 + $0x304] sm:$0xf] }
  0x62   :  { %879 = vmatpush.bf16.msra.mxu2 %v1300_v47  ;;  %v1484_v46 = vor.u32 %v1701_v43, %v1481_v44  ;;  %v1723_v47 = vld [vmem:[%s1899_s3 + $0x30] sm:$0xff] }
  0x63   :  { %891 = vmatpush.bf16.msra.mxu3 %v1372_v56  ;;  %v152_v56 = vld [vmem:[%s1898_s2] sm:$0x3] }
  0x64   :  { %854 = vmatpush.bf16.msra.mxu0 %v1164_v55  ;;  %v1717_v55 = vld [vmem:[%s1899_s3] sm:$0xff] }
  0x65   :  { %867 = vmatpush.bf16.msra.mxu1 %v1228_v57  ;;  %v154_v57 = vperm.slane %v152_v56, 0 }
  0x66   :  { %880 = vmatpush.bf16.msra.mxu2 %v1292_v0 }
  0x67   :  { %855 = vmatmul.bf16.vlgmr.msra.gmra.mxu0 %v1810_v2  ;;  %892 = vmatpush.bf16.msra.mxu3 %v1364_v5  ;;  %v1452_v2 = vor.u32 %v1693_v19, %v1449_v20  ;;  %v1729_v19 = vld [vmem:[%s1899_s3 + $0x60] sm:$0xff] }
  0x68   :  { %899 = vmatpush.bf16.msrb.mxu0 %v1476_v58  ;;  %868 = vmatmul.bf16.vlgmr.msra.gmra.mxu1 %v1805_v54  ;;  %v1707_v54 = vld [vmem:[#allocation2 + $0x334] sm:$0xf] }
  0x69   :  { %912 = vmatpush.bf16.msrb.mxu1 %v1540_v61  ;;  %881 = vmatmul.bf16.vlgmr.msra.gmra.mxu2 %v1813_v13  ;;  %v1508_v13 = vor.u32 %v1707_v54, %v1505_v25  ;;  %v1725_v25 = vld [vmem:[%s1899_s3 + $0x40] sm:$0xff] }
  0x6a   :  { %1061 = vmatpush.bf16.msrb.mxu2 %v1724_v9  ;;  %v1731_v9 = vld [vmem:[%s1899_s3 + $0x70] sm:$0xff] }
  0x6b   :  { %893 = vmatpush.bf16.msra.mxu3 %v1356_v16 }
  0x6c   :  { %900 = vmatpush.bf16.msrb.mxu0 %v1468_v6 }
  0x6d   :  { %913 = vmatpush.bf16.msrb.mxu1 %v1532_v10 }
  0x6e   :  { %894 = vmatmul.bf16.vlgmr.msra.gmra.mxu3 %v1823_v27  ;;  %v1428_v27 = vor.u32 %v1687_v36, %v1425_v37  ;;  %1062 = vmatpush.bf16.msrb.mxu2 %v1723_v47 }
  0x6f   :  { %1074 = vmatpush.bf16.msrb.mxu3 %v1732_v7 }
  0x70   :  { %901 = vmatpush.bf16.msrb.mxu0 %v1460_v17 }
  0x71   :  { %914 = vmatpush.bf16.msrb.mxu1 %v1524_v18 }
  0x72   :  { %1063 = vmatpush.bf16.msrb.mxu2 %v1722_v48 }
  0x73   :  { %1075 = vmatpush.bf16.msrb.mxu3 %v1731_v9 }
  0x74   :  { %902 = vmatpush.bf16.msrb.mxu0 %v1452_v2  ;;  %v1727_v2 = vld [vmem:[%s1899_s3 + $0x50] sm:$0xff] }
  0x75   :  { %915 = vmatpush.bf16.msrb.mxu1 %v1516_v23 }
  0x76   :  { %1064 = vmatpush.bf16.msrb.mxu2 %v1721_v49  ;;  %v1736_v49 = vld [vmem:[%s1900_s4] ss:$0 sm:$0xff] }
  0x77   :  { %1076 = vmatpush.bf16.msrb.mxu3 %v1730_v11 }
  0x78   :  { %903 = vmatpush.bf16.msrb.mxu0 %v1444_v26  ;;  %v155_v26 = vperm.slane %v152_v56, 1 }
  0x79   :  { %916 = vmatpush.bf16.msrb.mxu1 %v1508_v13 }
  0x7b   :  { %1077 = vmatpush.bf16.msrb.mxu3 %v1729_v19 }
  0x7c   :  { %904 = vmatpush.bf16.msrb.mxu0 %v1436_v34 }
  0x7d   :  { %917 = vmatpush.bf16.msrb.mxu1 %v1500_v35 }
  0x7f   :  { %1078 = vmatpush.bf16.msrb.mxu3 %v1728_v21 }
  0x80   :  { %905 = vmatpush.bf16.msrb.mxu0 %v1428_v27 }
  0x81   :  { %918 = vmatpush.bf16.msrb.mxu1 %v1492_v40 }
  0x83   :  { %1079 = vmatpush.bf16.msrb.mxu3 %v1727_v2 }
  0x84   :  { %906 = vmatpush.bf16.msrb.mxu0 %v1420_v45 }
  0x85   :  { %919 = vmatpush.bf16.msrb.mxu1 %v1484_v46 }
  0x87   :  { %907 = vmatmul.bf16.vlgmr.msrb.gmra.mxu0 %v1825_v29  ;;  %v1720_v29 = vld [vmem:[%s1899_s3 + $0x18] sm:$0xff]  ;;  %1080 = vmatpush.bf16.msrb.mxu3 %v1726_v24 }
  0x88   :  { %920 = vmatmul.bf16.vlgmr.msrb.gmra.mxu1 %v1827_v32  ;;  %1065 = vmatpush.bf16.msrb.mxu2 %v1720_v29  ;;  %v1719_v32 = vld [vmem:[%s1899_s3 + $0x10] sm:$0xff] }
  0x8b   :  { %1081 = vmatpush.bf16.msrb.mxu3 %v1725_v25 }
  0x8c   :  { %1066 = vmatpush.bf16.msrb.mxu2 %v1719_v32 }
  0x90   :  { %1067 = vmatpush.bf16.msrb.mxu2 %v1718_v50 }
  0x94   :  { %1068 = vmatpush.bf16.msrb.mxu2 %v1717_v55 }
  0xa4   :  { %v752_v51 = vpop.f32.mrf.mxu0 }
  0xa5   :  { %v765_v52 = vpop.f32.mrf.mxu1  ;;  %v753_v61 = vadd.f32 %v752_v51, %v154_v57 }
  0xa7   :  { %v766_v63 = vadd.f32 %v765_v52, %v753_v61 }
  0xac   :  { %v778_v53 = vpop.f32.mrf.mxu2  ;;  %v754_v58 = vpop.f32.mrf.mxu0 }
  0xad   :  { %v767_v59 = vpop.f32.mrf.mxu1  ;;  %v779_v3 = vadd.f32 %v778_v53, %v766_v63 }
  0xb1   :  { %v791_v60 = vpop.f32.mrf.mxu3 }
  0xb2   :  { %v792_v4 = vadd.f32 %v791_v60, %v779_v3 }
  0xb4   :  { %v780_v62 = vpop.f32.mrf.mxu2 }
  0xb9   :  { %v793_v0 = vpop.f32.mrf.mxu3 }
  0xc4   :  { %v804_v5 = vpop.f32.mrf.mxu0 }
  0xc5   :  { %v817_v6 = vpop.f32.mrf.mxu1  ;;  %v805_v8 = vadd.f32 %v804_v5, %v792_v4 }
  0xc7   :  { %v818_v10 = vadd.f32 %v817_v6, %v805_v8 }
  0xcc   :  { %v830_v12 = vpop.f32.mrf.mxu2  ;;  %v806_v15 = vpop.f32.mrf.mxu0 }
  0xcd   :  { %v831_v14 = vadd.f32 %v830_v12, %v818_v10  ;;  %v819_v16 = vpop.f32.mrf.mxu1 }
  0xcf   :  { %v925_v17 = vmax.f32 %v831_v14, 0.0 }
  0xd1   :  { %v927_v18 = vpack.c.bf16 %v925_v17, %v925_v17  ;;  %v843_v20 = vpop.f32.mrf.mxu3 }
  0xd2   :  { %v844_v31 = vadd.f32 %v843_v20, %v155_v26 }
  0xd3   :  { %1069 = vmatmul.bf16.vlgmr.msrb.gmra.mxu2 %v927_v18 }
  0xd4   :  { %v832_v22 = vpop.f32.mrf.mxu2 }
  0xd9   :  { %v845_v23 = vpop.f32.mrf.mxu3 }
  0xe4   :  { %v856_v1 = vpop.f32.mrf.mxu0 }
  0xe5   :  { %v869_v54 = vpop.f32.mrf.mxu1  ;;  %v857_v34 = vadd.f32 %v856_v1, %v844_v31 }
  0xe7   :  { %v870_v36 = vadd.f32 %v869_v54, %v857_v34 }
  0xec   :  { %v858_v13 = vpop.f32.mrf.mxu0  ;;  %v882_v28 = vpop.f32.mrf.mxu2 }
  0xed   :  { %v871_v30 = vpop.f32.mrf.mxu1  ;;  %v883_v38 = vadd.f32 %v882_v28, %v870_v36 }
  0xf1   :  { %v895_v33 = vpop.f32.mrf.mxu3 }
  0xf2   :  { %v896_v39 = vadd.f32 %v895_v33, %v883_v38 }
  0xf4   :  { %v884_v35 = vpop.f32.mrf.mxu2 }
  0xf9   :  { %v897_v37 = vpop.f32.mrf.mxu3 }
 0x104   :  { %v908_v27 = vpop.f32.mrf.mxu0 }
 0x105   :  { %v909_v40 = vadd.f32 %v908_v27, %v896_v39  ;;  %v921_v41 = vpop.f32.mrf.mxu1 }
 0x107   :  { %v922_v42 = vadd.f32 %v921_v41, %v909_v40 }
 0x109   :  { %v926_v43 = vmax.f32 %v922_v42, 0.0 }
 0x10b   :  { %v928_v44 = vpack.c.bf16 %v926_v43, %v926_v43 }
 0x10c   :  { %v910_v45 = vpop.f32.mrf.mxu0 }
 0x10d   :  { %v923_v46 = vpop.f32.mrf.mxu1  ;;  %1082 = vmatmul.bf16.vlgmr.msrb.gmra.mxu3 %v928_v44 }
 0x156   :  { %v1070_v47 = vpop.f32.mrf.mxu2 }
 0x157   :  { %v1071_v29 = vadd.f32 %v1736_v49, %v1070_v47 }
 0x15e   :  { %v1072_v48 = vpop.f32.mrf.mxu2 }
 0x190   :  { %v1083_v32 = vpop.f32.mrf.mxu3 }
 0x191   :  { %v1084_v50 = vadd.f32 %v1083_v32, %v1071_v29 }
 0x193   :  { %1087 = vst [vmem:[%s1901_s5] sm:$0xff] %v1084_v50 }
 0x198   :  { %v1085_v51 = vpop.f32.mrf.mxu3 }
 0x199   :  { %1092 = vsyncpa [#allocation3], 1 }

</bundles_post_ra>
